<compile_context>
chip_gen: v7x
topology: tpu7x:2x2x1
jax: 0.10.0
libtpu: 0.0.40
codegen_flags: <defaults>
</compile_context>

<pallas_src>
import functools

import jax
import jax.numpy as jnp
from jax import lax
from jax.experimental import pallas as pl
from jax.experimental.pallas import tpu as pltpu


def _round_up(x: int, m: int) -> int:
    return ((x + m - 1) // m) * m


def _tpu_vmem_bytes() -> int:
    try:
        return int(pltpu.get_tpu_info().vmem_capacity_bytes)
    except Exception:
        return 64 << 20                        # conservative (v7x-sized VMEM)


def _phase_loss_kernel(t_ref, x_ref, sid_ref, o_ref, *, total_rows, n_states):
    tb, _ = t_ref.shape                        # static block shape (TB, K)

    # Cast after the DMA (no-op for f32; bf16 inputs stream half the HBM bytes).
    t = t_ref[...].astype(jnp.float32)         # (TB, K)
    x = x_ref[...].astype(jnp.float32)

    cross = t * x                              # per-element t*x
    sq = t * t + x * x                         # per-element t^2 + x^2

    # Tail-block row mask: rows >= total_rows contain stale VMEM data
    # (Pallas does not zero out-of-bounds rows of the last input block).
    row0 = pl.program_id(0) * tb
    row_ids = row0 + lax.broadcasted_iota(jnp.int32, (tb, 1), 0)
    valid = row_ids < total_rows               # (TB, 1)

    # Sum of t^2 + x^2 over the block's valid rows (one lane reduce + masked sum).
    sq_rows = jnp.sum(sq, axis=-1, keepdims=True)                    # (TB, 1)
    partial = jnp.sum(jnp.where(valid, sq_rows, 0.0))

    # Per-(row, state) cross sums: lane k of a row has order (atom, state, d),
    # so its state is sid[k].  S is small & static -> S masked lane reduces on
    # otherwise-idle VPU/XLU slots (no MXU needed, exact f32 arithmetic).
    sid = sid_ref[...]                         # (1, K) int32
    for s in range(n_states):
        cross_s = jnp.sum(jnp.where(sid == s, cross, 0.0),
                          axis=-1, keepdims=True)                    # (TB, 1)
        partial -= 2.0 * jnp.sum(jnp.where(valid, jnp.abs(cross_s), 0.0))

    # Lane-dense, unmasked store of this block's partial into its own slab
    # (safe: each grid step owns a disjoint output block, grid is "parallel").
    o_ref[...] = jnp.broadcast_to(partial, o_ref.shape).astype(o_ref.dtype)


def phase_loss_atomistic_mse(inputs: jax.Array, targets: jax.Array, atoms: int,
                             *, target_block_bytes: int | None = None) -> jax.Array:
    """Pallas implementation of PhaseLossAtomisticMSE.forward."""
    assert inputs.shape == targets.shape
    N, S, D = targets.shape
    assert N % atoms == 0, "leading dim must be divisible by `atoms`"
    B = N // atoms                             # number of molecules
    K = atoms * S * D                          # per-molecule feature length
    inv_numel = 1.0 / float(N * S * D)
    itemsize = jnp.dtype(inputs.dtype).itemsize

    # Free reshapes (contiguous dim merges -- no transpose, no HBM copy, no pad).
    t2 = targets.reshape(B, K)
    x2 = inputs.reshape(B, K)
    # State id of each lane: lane k = atom*(S*D) + state*D + d  ->  (k//D) % S.
    state_id = ((jnp.arange(K, dtype=jnp.int32) // D) % S).reshape(1, K)

    # ---- VMEM-aware block sizing (v5e/v6e: 128 MiB, v7x: 64 MiB per core) ----
    vmem = min(max(_tpu_vmem_bytes(), 32 << 20), 128 << 20)
    vmem_limit = int(vmem * 0.72)              # scoped limit with headroom
    if target_block_bytes is None:
        # Budget: 2 inputs x 2 pipeline buffers + ~3 block-sized f32 temps.
        denom = 4 + (3 * 4) // itemsize
        target_block_bytes = max(1 << 20,
                                 min(16 << 20, (vmem_limit * 4 // 5) // denom))

    bytes_per_row = K * itemsize
    # TODO(synk): if K is so large that even 8 rows overflow VMEM, add a second
    # ("arbitrary") grid axis over K with a VMEM accumulator + pl.when finalize.
    rows_budget = max(8, (target_block_bytes // bytes_per_row) // 8 * 8)

    if B <= rows_budget:
        # Whole problem fits one block; still split in two when B is large
        # enough so both TensorCores on v7x get a balanced share.
        TB = _round_up(pl.cdiv(B, 2), 8) if B >= 16 else B
    else:
        TB = rows_budget                       # multiple of 8 (sublane tiling)
    G = pl.cdiv(B, TB)                         # tail block masked in-kernel

    cost = pl.CostEstimate(
        flops=(4 + 3 * S) * N * S * D,
        transcendentals=0,
        bytes_accessed=2 * N * S * D * itemsize + K * 4 + G * 128 * 4,
    )

    kernel = functools.partial(_phase_loss_kernel, total_rows=B, n_states=S)

    out = pl.pallas_call(
        kernel,
        out_shape=jax.ShapeDtypeStruct((1, G * 128), jnp.float32),
        grid_spec=pltpu.PrefetchScalarGridSpec(
            num_scalar_prefetch=0,
            grid=(G,),
            in_specs=[
                pl.BlockSpec((TB, K), lambda i: (i, 0)),   # targets rows
                pl.BlockSpec((TB, K), lambda i: (i, 0)),   # inputs rows
                pl.BlockSpec((1, K), lambda i: (0, 0)),    # lane -> state map
            ],
            # Each grid step owns its own 128-lane slab of the output row.
            out_specs=pl.BlockSpec((1, 128), lambda i: (0, i)),
        ),
        compiler_params=pltpu.CompilerParams(
            dimension_semantics=("parallel",),   # independent blocks -> megacore
            vmem_limit_bytes=vmem_limit,
        ),
        cost_estimate=cost,
    )(t2, x2, state_id)

    # Epilogue in JAX: pick one lane per block, sum, normalize.
    partials = out.reshape(G, 128)[:, 0]
    return jnp.sum(partials) * inv_numel


def _reference(inputs, targets, atoms):
    N, S, D = targets.shape
    B = N // atoms
    t = targets.reshape(B, atoms, S, D).astype(jnp.float32)
    x = inputs.reshape(B, atoms, S, D).astype(jnp.float32)
    pos = jnp.sum(jnp.square(t + x), axis=(1, 3))
    neg = jnp.sum(jnp.square(t - x), axis=(1, 3))
    return jnp.sum(jnp.minimum(pos, neg)) / float(N * S * D)


if __name__ == "__main__":
    # Small, deterministic example: 2 molecules x 4 atoms, 3 states, 3 dims.
    atoms = 4
    batch = 2
    S, D = 3, 3
    N = batch * atoms

    key = jax.random.PRNGKey(0)
    k_in, k_tg = jax.random.split(key)
    inputs = jax.random.normal(k_in, (N, S, D), dtype=jnp.float32)
    targets = jax.random.normal(k_tg, (N, S, D), dtype=jnp.float32)

    loss = jax.block_until_ready(phase_loss_atomistic_mse(inputs, targets, atoms))
    ref = jax.block_until_ready(_reference(inputs, targets, atoms))
    assert jnp.allclose(loss, ref, rtol=1e-5, atol=1e-6), (loss, ref)

    print("KERNEL_OK")
</pallas_src>

<mosaic_0001>
module attributes {stable_mosaic.version = 11 : i64} {
  func.func @_phase_loss_kernel(%arg0: i32, %arg1: memref<2x36xf32, #tpu.memory_space<vmem>>, %arg2: memref<2x36xf32, #tpu.memory_space<vmem>>, %arg3: memref<1x36xi32, #tpu.memory_space<vmem>>, %arg4: memref<1x128xf32, #tpu.memory_space<vmem>>) attributes {dimension_semantics = [#tpu.dimension_semantics<parallel>], iteration_bounds = array<i64: 1>, scalar_prefetch = 0 : i64, scratch_operands = 0 : i64, tpu.core_type = #tpu.core_type<tc>, window_params = [{transform_indices = @transform_0, window_bounds = array<i64: 2, 36>}, {transform_indices = @transform_1, window_bounds = array<i64: 2, 36>}, {pipeline_mode = #tpu.pipeline_mode<synchronous>, transform_indices = @transform_2, window_bounds = array<i64: 1, 36>}, {transform_indices = @transform_3, window_bounds = array<i64: 1, 128>}]} {
    %c0 = arith.constant 0 : index
    %c0_0 = arith.constant 0 : index
    %0 = vector.load %arg1[%c0, %c0_0] : memref<2x36xf32, #tpu.memory_space<vmem>>, vector<2x36xf32>
    %c0_1 = arith.constant 0 : index
    %c0_2 = arith.constant 0 : index
    %1 = vector.load %arg2[%c0_1, %c0_2] : memref<2x36xf32, #tpu.memory_space<vmem>>, vector<2x36xf32>
    %2 = arith.mulf %0, %1 : vector<2x36xf32>
    %3 = arith.mulf %0, %0 : vector<2x36xf32>
    %4 = arith.mulf %1, %1 : vector<2x36xf32>
    %5 = arith.addf %3, %4 : vector<2x36xf32>
    %c2_i32 = arith.constant 2 : i32
    %6 = arith.muli %arg0, %c2_i32 : i32
    %7 = tpu.iota {dimensions = array<i32: 0>} : vector<2x1xi32>
    %8 = vector.broadcast %6 : i32 to vector<2x1xi32>
    %9 = arith.addi %8, %7 : vector<2x1xi32>
    %c2_i32_3 = arith.constant 2 : i32
    %10 = vector.broadcast %c2_i32_3 : i32 to vector<2x1xi32>
    %11 = arith.cmpi slt, %9, %10 : vector<2x1xi32>
    %cst = arith.constant dense<0.000000e+00> : vector<2xf32>
    %12 = vector.multi_reduction <add>, %5, %cst [1] : vector<2x36xf32> to vector<2xf32>
    %13 = vector.shape_cast %12 : vector<2xf32> to vector<2x1xf32>
    %cst_4 = arith.constant 0.000000e+00 : f32
    %14 = vector.broadcast %cst_4 : f32 to vector<2x1xf32>
    %15 = arith.select %11, %13, %14 : vector<2x1xi1>, vector<2x1xf32>
    %16 = vector.shape_cast %15 : vector<2x1xf32> to vector<1x2x1xf32>
    %cst_5 = arith.constant dense<0.000000e+00> : vector<1xf32>
    %17 = vector.multi_reduction <add>, %16, %cst_5 [1, 2] : vector<1x2x1xf32> to vector<1xf32>
    %18 = vector.shape_cast %17 : vector<1xf32> to vector<1x1x1xf32>
    %19 = vector.extract %18[0, 0, 0] : f32 from vector<1x1x1xf32>
    %c0_6 = arith.constant 0 : index
    %c0_7 = arith.constant 0 : index
    %20 = vector.load %arg3[%c0_6, %c0_7] : memref<1x36xi32, #tpu.memory_space<vmem>>, vector<1x36xi32>
    %c0_i32 = arith.constant 0 : i32
    %21 = vector.broadcast %c0_i32 : i32 to vector<1x36xi32>
    %22 = arith.cmpi eq, %20, %21 : vector<1x36xi32>
    %cst_8 = arith.constant 0.000000e+00 : f32
    %23 = vector.shape_cast %22 : vector<1x36xi1> to vector<1x36xi1>
    %24 = vector.broadcast %23 : vector<1x36xi1> to vector<2x36xi1>
    %25 = vector.broadcast %cst_8 : f32 to vector<2x36xf32>
    %26 = arith.select %24, %2, %25 : vector<2x36xi1>, vector<2x36xf32>
    %cst_9 = arith.constant dense<0.000000e+00> : vector<2xf32>
    %27 = vector.multi_reduction <add>, %26, %cst_9 [1] : vector<2x36xf32> to vector<2xf32>
    %28 = vector.shape_cast %27 : vector<2xf32> to vector<2x1xf32>
    %29 = math.absf %28 : vector<2x1xf32>
    %cst_10 = arith.constant 0.000000e+00 : f32
    %30 = vector.broadcast %cst_10 : f32 to vector<2x1xf32>
    %31 = arith.select %11, %29, %30 : vector<2x1xi1>, vector<2x1xf32>
    %32 = vector.shape_cast %31 : vector<2x1xf32> to vector<1x2x1xf32>
    %cst_11 = arith.constant dense<0.000000e+00> : vector<1xf32>
    %33 = vector.multi_reduction <add>, %32, %cst_11 [1, 2] : vector<1x2x1xf32> to vector<1xf32>
    %34 = vector.shape_cast %33 : vector<1xf32> to vector<1x1x1xf32>
    %35 = vector.extract %34[0, 0, 0] : f32 from vector<1x1x1xf32>
    %cst_12 = arith.constant 2.000000e+00 : f32
    %36 = arith.mulf %cst_12, %35 : f32
    %37 = arith.subf %19, %36 : f32
    %c1_i32 = arith.constant 1 : i32
    %38 = vector.broadcast %c1_i32 : i32 to vector<1x36xi32>
    %39 = arith.cmpi eq, %20, %38 : vector<1x36xi32>
    %cst_13 = arith.constant 0.000000e+00 : f32
    %40 = vector.shape_cast %39 : vector<1x36xi1> to vector<1x36xi1>
    %41 = vector.broadcast %40 : vector<1x36xi1> to vector<2x36xi1>
    %42 = vector.broadcast %cst_13 : f32 to vector<2x36xf32>
    %43 = arith.select %41, %2, %42 : vector<2x36xi1>, vector<2x36xf32>
    %cst_14 = arith.constant dense<0.000000e+00> : vector<2xf32>
    %44 = vector.multi_reduction <add>, %43, %cst_14 [1] : vector<2x36xf32> to vector<2xf32>
    %45 = vector.shape_cast %44 : vector<2xf32> to vector<2x1xf32>
    %46 = math.absf %45 : vector<2x1xf32>
    %cst_15 = arith.constant 0.000000e+00 : f32
    %47 = vector.broadcast %cst_15 : f32 to vector<2x1xf32>
    %48 = arith.select %11, %46, %47 : vector<2x1xi1>, vector<2x1xf32>
    %49 = vector.shape_cast %48 : vector<2x1xf32> to vector<1x2x1xf32>
    %cst_16 = arith.constant dense<0.000000e+00> : vector<1xf32>
    %50 = vector.multi_reduction <add>, %49, %cst_16 [1, 2] : vector<1x2x1xf32> to vector<1xf32>
    %51 = vector.shape_cast %50 : vector<1xf32> to vector<1x1x1xf32>
    %52 = vector.extract %51[0, 0, 0] : f32 from vector<1x1x1xf32>
    %cst_17 = arith.constant 2.000000e+00 : f32
    %53 = arith.mulf %cst_17, %52 : f32
    %54 = arith.subf %37, %53 : f32
    %c2_i32_18 = arith.constant 2 : i32
    %55 = vector.broadcast %c2_i32_18 : i32 to vector<1x36xi32>
    %56 = arith.cmpi eq, %20, %55 : vector<1x36xi32>
    %cst_19 = arith.constant 0.000000e+00 : f32
    %57 = vector.shape_cast %56 : vector<1x36xi1> to vector<1x36xi1>
    %58 = vector.broadcast %57 : vector<1x36xi1> to vector<2x36xi1>
    %59 = vector.broadcast %cst_19 : f32 to vector<2x36xf32>
    %60 = arith.select %58, %2, %59 : vector<2x36xi1>, vector<2x36xf32>
    %cst_20 = arith.constant dense<0.000000e+00> : vector<2xf32>
    %61 = vector.multi_reduction <add>, %60, %cst_20 [1] : vector<2x36xf32> to vector<2xf32>
    %62 = vector.shape_cast %61 : vector<2xf32> to vector<2x1xf32>
    %63 = math.absf %62 : vector<2x1xf32>
    %cst_21 = arith.constant 0.000000e+00 : f32
    %64 = vector.broadcast %cst_21 : f32 to vector<2x1xf32>
    %65 = arith.select %11, %63, %64 : vector<2x1xi1>, vector<2x1xf32>
    %66 = vector.shape_cast %65 : vector<2x1xf32> to vector<1x2x1xf32>
    %cst_22 = arith.constant dense<0.000000e+00> : vector<1xf32>
    %67 = vector.multi_reduction <add>, %66, %cst_22 [1, 2] : vector<1x2x1xf32> to vector<1xf32>
    %68 = vector.shape_cast %67 : vector<1xf32> to vector<1x1x1xf32>
    %69 = vector.extract %68[0, 0, 0] : f32 from vector<1x1x1xf32>
    %cst_23 = arith.constant 2.000000e+00 : f32
    %70 = arith.mulf %cst_23, %69 : f32
    %71 = arith.subf %54, %70 : f32
    %72 = vector.broadcast %71 : f32 to vector<1x128xf32>
    %c0_24 = arith.constant 0 : index
    %c0_25 = arith.constant 0 : index
    %73 = vector.load %arg4[%c0_24, %c0_25] : memref<1x128xf32, #tpu.memory_space<vmem>>, vector<1x128xf32>
    tpu.vector_store %arg4[%c0_24, %c0_25], %72 {strides = array<i32>} : memref<1x128xf32, #tpu.memory_space<vmem>>, vector<1x128xf32>,
    return
  }
  func.func @transform_0(%arg0: i32) -> (i32, i32) {
    %c0_i32 = arith.constant 0 : i32
    %c0_i32_0 = arith.constant 0 : i32
    return %arg0, %c0_i32 : i32, i32
  }
  func.func @transform_1(%arg0: i32) -> (i32, i32) {
    %c0_i32 = arith.constant 0 : i32
    %c0_i32_0 = arith.constant 0 : i32
    return %arg0, %c0_i32 : i32, i32
  }
  func.func @transform_2(%arg0: i32) -> (i32, i32) {
    %c0_i32 = arith.constant 0 : i32
    %c0_i32_0 = arith.constant 0 : i32
    %c0_i32_1 = arith.constant 0 : i32
    return %c0_i32, %c0_i32_0 : i32, i32
  }
  func.func @transform_3(%arg0: i32) -> (i32, i32) {
    %c0_i32 = arith.constant 0 : i32
    %c0_i32_0 = arith.constant 0 : i32
    return %c0_i32, %arg0 : i32, i32
  }
}

</mosaic_0001>

<bundles_post_ra>
// kernel: tpu_custom_call.1
= control target key start
LH: loop header
LB: loop body
LE: loop exit
PB: predicated region body
PF: predicated region fallthrough
CT: control target
= control target key end

     0   :  { %8 = vsyncpa [#allocation3], 0  ;;  %s260_s0 = inlined_call_operand.hbm [shape: f32[2,36], index: 0, kind: input, shape index: {}]   ;;  %s261_s1 = inlined_call_operand.vmem [shape: f32[2,36], index: 1, kind: input, shape index: {}]   ;;  %s262_s2 = inlined_call_operand.vmem [shape: s32[1,36], index: 2, kind: input, shape index: {}]   ;;  %s263_s3 = inlined_call_operand.hbm [shape: f32[1,128], index: 3, kind: output, shape index: {}]  }
   0x1   :  { %9 = vsyncpa [#allocation4], 0  ;;  %s207_s12 = smov [#allocation2]   ;;  %s159_s16 = scalar_lea.hbm %s260_s0, 32 }
   0x2   :  { %s16_s13 = sshll.u32 %s207_s12, 4  ;;  %p160_p0 = scmp.ne.s32.totalorder %s260_s0, %s159_s16  ;;  %s17_s13 = int_to_ptr.vmem [resolvable:$true] %s16_s13 }
   0x3   :  { %p163_p1 = scmp.lt.u32.totalorder %s159_s16, %s260_s0 }
   0x5   :  { %p165_p2 = pnand %p163_p1, %p160_p0 }
   0x7   :  { %168 = shalt.err (!%p165_p2)
}
   0x8   :  { %s169_s21 = scalar_lea.vmem %s17_s13, 32  ;;  %p174_p4 = scmp.lt.s32.totalorder %s17_s13, %s17_s13 }
   0x9   :  { %p170_p3 = scmp.ne.s32.totalorder %s17_s13, %s169_s21  ;;  %p175_p5 = scmp.lt.s32.totalorder %s169_s21, %s169_s21 }
   0xb   :  { %p176_p6 = por %p175_p5, %p174_p4 }
   0xd   :  { %p177_p7 = pnand %p176_p6, %p170_p3 }
   0xf   :  { %180 = shalt.err (!%p177_p7)
}
  0x10   :  { %19 = dma.hbm_to_vmem [thread:$0]  %s260_s0, 32, %s17_s13, [#allocation3]  }
  0x11   :  { %203 = dma.done.wait [#allocation3], 32  }
  0x12   :  { %204 = vsyncadd [#allocation3], 4294967264  ;;  %v34_v0 = vlaneseq  ;;  %v27_v3 = vld [vmem:[#allocation2] sm:$0x3]  ;;  %v208_v7 = vmov 0   ;;  %vm39_vm3 = vcmask 287744  }
  0x13   :  { %v28_v4 = vld [vmem:[%s261_s1] sm:$0x3]  ;;  %v30_v11 = vmul.f32 %v27_v3, %v27_v3  ;;  %vm44_vm8 = vcmask 1024   ;;  %s209_s5 = smov [#allocation5]  }
  0x14   :  { %v35_v1 = vshrl.u32 %v34_v0, 7  ;;  %v55_v5 = vld [vmem:[%s262_s2] sm:$0x1]  ;;  %v29_v6 = vmul.f32 %v28_v4, %v27_v3  ;;  %v31_v15 = vmul.f32 %v28_v4, %v28_v4  ;;  %s139_s6 = sshll.u32 %s209_s5, 4  ;;  %s140_s6 = int_to_ptr.vmem [resolvable:$true] %s139_s6 }
  0x15   :  { %vm81_vm0 = vcmp.eq.s32.totalorder %v55_v5, 1  ;;  %vm56_vm1 = vcmp.eq.s32.totalorder %v55_v5, 0  ;;  %vm106_vm2 = vcmp.eq.s32.totalorder %v55_v5, 2  ;;  %s181_s10 = scalar_lea.vmem %s140_s6, 16  ;;  %s185_s11 = scalar_lea.vmem %s140_s6, 32 }
  0x16   :  { %v60_v2 = vsub.s32 0, %v35_v1  ;;  %v82_v8 = vsel %vm81_vm0, 1, %v208_v7  ;;  %v57_v9 = vsel %vm56_vm1, 1, %v208_v7  ;;  %v107_v10 = vsel %vm106_vm2, 1, %v208_v7  ;;  %p182_p8 = scmp.ne.s32.totalorder %s140_s6, %s181_s10  ;;  %p186_p9 = scmp.lt.s32.totalorder %s140_s6, %s140_s6 }
  0x17   :  { %v32_v16 = vadd.f32 %v31_v15, %v30_v11  ;;  %vm38_vm7 = vcmp.lt.s32.totalorder %v35_v1, 2  ;;  %p187_p10 = scmp.lt.s32.totalorder %s185_s11, %s181_s10 }
  0x18   :  { %v86_v12 = vrot.slane %v82_v8, %v60_v2  ;;  %v61_v13 = vrot.slane %v57_v9, %v60_v2  ;;  %v111_v14 = vrot.slane %v107_v10, %v60_v2 }
  0x19   :  { %v40_v23 = vsel %vm39_vm3, %v32_v16, 0.0  ;;  %p188_p11 = por %p187_p10, %p186_p9 }
  0x1a   :  { %vm87_vm4 = vcmp.eq.s32.totalorder %v86_v12, 1  ;;  %vm62_vm5 = vcmp.eq.s32.totalorder %v61_v13, 1  ;;  %vm112_vm6 = vcmp.eq.s32.totalorder %v111_v14, 1 }
  0x1b   :  { %v88_v17 = vsel %vm87_vm4, %v29_v6, 0.0  ;;  %v63_v18 = vsel %vm62_vm5, %v29_v6, 0.0  ;;  %v113_v19 = vsel %vm112_vm6, %v29_v6, 0.0  ;;  %p189_p12 = pnand %p188_p11, %p182_p8 }
  0x1c   :  { %v89_v20 = vsel %vm39_vm3, %v88_v17, 0.0  ;;  %v64_v21 = vsel %vm39_vm3, %v63_v18, 0.0  ;;  %v114_v22 = vsel %vm39_vm3, %v113_v19, 0.0 }
  0x1d   :  { %90 = vadd.xlane.f32.xlu1 %v89_v20  ;;  %65 = vadd.xlane.f32.xlu0 %v64_v21 }
  0x21   :  { %115 = vadd.xlane.f32.xlu1 %v114_v22  ;;  %41 = vadd.xlane.f32.xlu0 %v40_v23 }
  0xaa   :  { %v91_v24 = vpop.xlane.xlu1 %90  ;;  %v66_v25 = vpop.xlane.xlu0 %65 }
  0xab   :  { %v67_v26 = vand.u32 2147483647, %v66_v25  ;;  %v92_v27 = vand.u32 2147483647, %v91_v24 }
  0xad   :  { %v68_v28 = vsel %vm38_vm7, %v67_v26, 0.0  ;;  %v93_v36 = vsel %vm38_vm7, %v92_v27, 0.0 }
  0xae   :  { %v116_v29 = vpop.xlane.xlu1 %115  ;;  %v42_v30 = vpop.xlane.xlu0 %41  ;;  %v69_v31 = vsel %vm44_vm8, %v68_v28, 0.0  ;;  %v94_v38 = vsel %vm44_vm8, %v93_v36, 0.0 }
  0xaf   :  { %v117_v32 = vand.u32 2147483647, %v116_v29  ;;  %v43_v33 = vsel %vm38_vm7, %v42_v30, 0.0  ;;  %70 = vadd.xlane.f32.xlu1 %v69_v31 }
  0xb0   :  { %v45_v34 = vsel %vm44_vm8, %v43_v33, 0.0 }
  0xb1   :  { %46 = vadd.xlane.f32.xlu0 %v45_v34  ;;  %v118_v35 = vsel %vm38_vm7, %v117_v32, 0.0 }
  0xb2   :  { %v119_v37 = vsel %vm44_vm8, %v118_v35, 0.0 }
  0xb3   :  { %120 = vadd.xlane.f32.xlu1 %v119_v37 }
  0xb5   :  { %95 = vadd.xlane.f32.xlu0 %v94_v38 }
 0x13c   :  { %v71_v39 = vpop.xlane.xlu1 %70 }
 0x13d   :  { %v72_v40 = vrot.slane %v71_v39, 4 }
 0x13e   :  { %v47_v41 = vpop.xlane.xlu0 %46 }
 0x13f   :  { %v73_v42 = vadd.f32 %v72_v40, %v71_v39  ;;  %v48_v43 = vrot.slane %v47_v41, 4 }
 0x140   :  { %v121_v44 = vpop.xlane.xlu1 %120 }
 0x141   :  { %v74_v45 = vrot.slane %v73_v42, 2  ;;  %v49_v46 = vadd.f32 %v48_v43, %v47_v41  ;;  %v122_v47 = vrot.slane %v121_v44, 4 }
 0x142   :  { %v96_v48 = vpop.xlane.xlu0 %95 }
 0x143   :  { %v50_v49 = vrot.slane %v49_v46, 2  ;;  %v123_v50 = vadd.f32 %v122_v47, %v121_v44  ;;  %v97_v51 = vrot.slane %v96_v48, 4  ;;  %v75_v52 = vadd.f32 %v74_v45, %v73_v42 }
 0x145   :  { %v124_v53 = vrot.slane %v123_v50, 2  ;;  %v98_v54 = vadd.f32 %v97_v51, %v96_v48  ;;  %v51_v55 = vadd.f32 %v50_v49, %v49_v46  ;;  %v76_v56 = vrot.slane %v75_v52, 1 }
 0x147   :  { %v125_v57 = vadd.f32 %v124_v53, %v123_v50  ;;  %v99_v58 = vrot.slane %v98_v54, 2  ;;  %v52_v59 = vrot.slane %v51_v55, 1  ;;  %v77_v62 = vadd.f32 %v76_v56, %v75_v52 }
 0x149   :  { %v100_v60 = vadd.f32 %v99_v58, %v98_v54  ;;  %v53_v61 = vadd.f32 %v52_v59, %v51_v55  ;;  %v126_v63 = vrot.slane %v125_v57, 1 }
 0x14b   :  { %148 = vpush %v53_v61  ;;  %v101_v0 = vrot.slane %v100_v60, 1  ;;  %v127_v2 = vadd.f32 %v126_v63, %v125_v57 }
 0x14c   :  { %150 = vpush %v77_v62 }
 0x14d   :  { %v102_v1 = vadd.f32 %v101_v0, %v100_v60 }
 0x14f   :  { %152 = vpush %v102_v1 }
 0x150   :  { %154 = vpush %v127_v2 }
 0x17c   :  { %s149_s0 = spop %148 }
 0x17d   :  { %s151_s1 = spop %150 }
 0x17e   :  { %s79_s2 = smul.f32 2.0, %s151_s1 }
 0x180   :  { %s80_s28 = ssub.f32 %s149_s0, %s79_s2  ;;  %s153_s29 = spop %152 }
 0x181   :  { %s104_s30 = smul.f32 2.0, %s153_s29  ;;  %s155_s4 = spop %154 }
 0x182   :  { %s129_s8 = smul.f32 2.0, %s155_s4 }
 0x183   :  { %s105_s7 = ssub.f32 %s80_s28, %s104_s30 }
 0x185   :  { %s130_s9 = ssub.f32 %s105_s7, %s129_s8 }
 0x187   :  { %v131_v3 = vstv %s130_s9 }
 0x188   :  { %132 = vst [vmem:[#allocation5] sm:$0x1] %v131_v3 }
 0x189   :  { %192 = shalt.err (!%p189_p12)
}
 0x18a   :  { %s193_s14 = scalar_lea.hbm %s263_s3, 16 }
 0x18b   :  { %p194_p13 = scmp.ne.s32.totalorder %s263_s3, %s193_s14  ;;  %p197_p0 = scmp.lt.u32.totalorder %s193_s14, %s263_s3 }
 0x18d   :  { %p199_p1 = pnand %p197_p0, %p194_p13 }
 0x18f   :  { %202 = shalt.err (!%p199_p1)
}
 0x190   :  { %142 = dma.vmem_to_hbm [thread:$0]  %s140_s6, 16, %s263_s3, [#allocation4]  }
 0x191   :  { %205 = dma.done.wait [#allocation4], 16  }
 0x192   :  { %206 = vsyncadd [#allocation4], 4294967280 }
 0x193   :  { %146 = vsyncpa [#allocation3], 1 }
 0x194   :  { %147 = vsyncpa [#allocation4], 1 }

</bundles_post_ra>
